<compile_context>
chip_gen: v7x
topology: tpu7x:2x2x1
jax: 0.10.0
libtpu: 0.0.40
codegen_flags: <defaults>
</compile_context>

<pallas_src>
import jax
import jax.numpy as jnp
from jax.experimental import pallas as pl
from jax.experimental.pallas import tpu as pltpu


def _critic_kernel(s_ref, a_ref, w1s_ref, w1a_ref, b1_ref,
                   w2_ref, b2_ref, wq_ref, bq_ref, out_ref):
    # s_ref  : (TM, D_state)     a_ref  : (TM, n_actions)
    # w1s_ref: (D_state, F1)     w1a_ref: (n_actions, F1)    b1_ref: (1, F1)
    # w2_ref : (F1, F2)          b2_ref : (1, F2)
    # wq_ref : (1, F2)           bq_ref : (1, 1)
    # out_ref: (TM, 1)

    # Fused concat:  cat([s, a]) @ W1  ==  s @ W1[:D] + a @ W1[D:]
    h1 = (jnp.dot(s_ref[...], w1s_ref[...], preferred_element_type=jnp.float32)
          + jnp.dot(a_ref[...], w1a_ref[...], preferred_element_type=jnp.float32)
          + b1_ref[...])
    h1 = jnp.maximum(h1, 0.0)

    h2 = jnp.dot(h1, w2_ref[...], preferred_element_type=jnp.float32) + b2_ref[...]
    h2 = jnp.maximum(h2, 0.0)

    # Final (F2 -> 1) projection: VPU multiply + XLU lane-reduce instead of an
    # N=1 MXU matmul (which would waste the whole result buffer for one lane).
    q = jnp.sum(h2 * wq_ref[...], axis=-1, keepdims=True) + bq_ref[...]
    out_ref[...] = q.astype(out_ref.dtype)


def _round_up(x, m):
    return ((x + m - 1) // m) * m


@jax.jit
def critic_forward(state, action, params):
    """state: (B, input_dims[0]), action: (B, n_actions) -> (B, 1) f32."""
    w1s, w1a, b1 = params["w1_s"], params["w1_a"], params["b1"]
    w2, b2 = params["w2"], params["b2"]
    wq, bq = params["wq"], params["bq"]

    B, d_state = state.shape
    n_actions = action.shape[1]
    f1 = w1s.shape[1]
    f2 = w2.shape[1]

    # Batch tile: multiple of 8 sublanes, capped at 256 rows (amortizes the
    # ~0.35 us per-step overhead while staying far below VMEM limits on all
    # of v5e / v6e / v7x — per-tile activations here are only a few KiB).
    tm = min(256, _round_up(B, 8))
    grid = (pl.cdiv(B, tm),)

    batch_spec = lambda cols: pl.BlockSpec((tm, cols), lambda i: (i, 0))
    # Weights/biases: same block for every grid step -> stay VMEM-resident.
    resident = lambda shape: pl.BlockSpec(shape, lambda i: (0, 0))

    flops = 2 * B * (d_state * f1 + n_actions * f1 + f1 * f2 + f2)
    bytes_accessed = 4 * (state.size + action.size + w1s.size + w1a.size
                          + b1.size + w2.size + b2.size + wq.size + bq.size + B)

    return pl.pallas_call(
        _critic_kernel,
        out_shape=jax.ShapeDtypeStruct((B, 1), jnp.float32),
        grid=grid,
        in_specs=[
            batch_spec(d_state),        # state tile
            batch_spec(n_actions),      # action tile
            resident(w1s.shape), resident(w1a.shape), resident(b1.shape),
            resident(w2.shape), resident(b2.shape),
            resident(wq.shape), resident(bq.shape),
        ],
        out_specs=pl.BlockSpec((tm, 1), lambda i: (i, 0)),
        compiler_params=pltpu.CompilerParams(
            dimension_semantics=("parallel",)),
        cost_estimate=pl.CostEstimate(
            flops=flops, transcendentals=0, bytes_accessed=bytes_accessed),
    )(state, action, w1s, w1a, b1, w2, b2, wq, bq)


def init_critic_params(key, input_dim, n_actions, fc1_dims, fc2_dims):
    """PyTorch-style uniform(-1/sqrt(fan_in), 1/sqrt(fan_in)) init.

    Weights are stored as (in_features, out_features); W1 is pre-split into
    the state and action halves so the kernel never needs the concat, and the
    final layer's weight is stored as a (1, fc2_dims) row for the VPU reduce.
    """
    d_in = input_dim + n_actions
    ks = jax.random.split(key, 6)

    def unif(k, shape, fan_in):
        bound = 1.0 / (float(fan_in) ** 0.5)
        return jax.random.uniform(k, shape, jnp.float32, -bound, bound)

    w1 = unif(ks[0], (d_in, fc1_dims), d_in)
    return {
        "w1_s": w1[:input_dim],                       # (input_dim, fc1)
        "w1_a": w1[input_dim:],                       # (n_actions, fc1)
        "b1": unif(ks[1], (1, fc1_dims), d_in),
        "w2": unif(ks[2], (fc1_dims, fc2_dims), fc1_dims),
        "b2": unif(ks[3], (1, fc2_dims), fc1_dims),
        "wq": unif(ks[4], (1, fc2_dims), fc2_dims),   # row vector (1, fc2)
        "bq": unif(ks[5], (1, 1), fc2_dims),
    }


if __name__ == "__main__":
    # Shapes consistent with the module's forward:
    #   input_dims = [16], n_actions = 4, fc1_dims = 32, fc2_dims = 32, batch = 2
    B, INPUT_DIM, N_ACTIONS, FC1, FC2 = 2, 16, 4, 32, 32

    key = jax.random.PRNGKey(0)
    k_state, k_action, k_params = jax.random.split(key, 3)

    state = jax.random.normal(k_state, (B, INPUT_DIM), jnp.float32)
    action = jax.random.normal(k_action, (B, N_ACTIONS), jnp.float32)
    params = init_critic_params(k_params, INPUT_DIM, N_ACTIONS, FC1, FC2)

    q = jax.block_until_ready(critic_forward(state, action, params))

    # Pure-JAX reference of the exact PyTorch semantics (with the concat).
    x = jnp.concatenate([state, action], axis=1)
    w1_full = jnp.concatenate([params["w1_s"], params["w1_a"]], axis=0)
    h1 = jnp.maximum(x @ w1_full + params["b1"], 0.0)
    h2 = jnp.maximum(h1 @ params["w2"] + params["b2"], 0.0)
    q_ref = h2 @ params["wq"].T + params["bq"]

    assert q.shape == (B, 1)
    assert jnp.allclose(q, q_ref, atol=1e-5, rtol=1e-5)

    print("KERNEL_OK")
</pallas_src>

<mosaic_0001>
module attributes {stable_mosaic.version = 11 : i64} {
  func.func @_critic_kernel(%arg0: i32, %arg1: memref<8x16xf32, #tpu.memory_space<vmem>>, %arg2: memref<8x4xf32, #tpu.memory_space<vmem>>, %arg3: memref<16x32xf32, #tpu.memory_space<vmem>>, %arg4: memref<4x32xf32, #tpu.memory_space<vmem>>, %arg5: memref<1x32xf32, #tpu.memory_space<vmem>>, %arg6: memref<32x32xf32, #tpu.memory_space<vmem>>, %arg7: memref<1x32xf32, #tpu.memory_space<vmem>>, %arg8: memref<1x32xf32, #tpu.memory_space<vmem>>, %arg9: memref<1x1xf32, #tpu.memory_space<vmem>>, %arg10: memref<8x1xf32, #tpu.memory_space<vmem>>) attributes {dimension_semantics = [#tpu.dimension_semantics<parallel>], iteration_bounds = array<i64: 1>, scalar_prefetch = 0 : i64, scratch_operands = 0 : i64, tpu.core_type = #tpu.core_type<tc>, window_params = [{transform_indices = @transform_0, window_bounds = array<i64: 8, 16>}, {transform_indices = @transform_1, window_bounds = array<i64: 8, 4>}, {pipeline_mode = #tpu.pipeline_mode<synchronous>, transform_indices = @transform_2, window_bounds = array<i64: 16, 32>}, {pipeline_mode = #tpu.pipeline_mode<synchronous>, transform_indices = @transform_3, window_bounds = array<i64: 4, 32>}, {pipeline_mode = #tpu.pipeline_mode<synchronous>, transform_indices = @transform_4, window_bounds = array<i64: 1, 32>}, {pipeline_mode = #tpu.pipeline_mode<synchronous>, transform_indices = @transform_5, window_bounds = array<i64: 32, 32>}, {pipeline_mode = #tpu.pipeline_mode<synchronous>, transform_indices = @transform_6, window_bounds = array<i64: 1, 32>}, {pipeline_mode = #tpu.pipeline_mode<synchronous>, transform_indices = @transform_7, window_bounds = array<i64: 1, 32>}, {pipeline_mode = #tpu.pipeline_mode<synchronous>, transform_indices = @transform_8, window_bounds = array<i64: 1, 1>}, {transform_indices = @transform_9, window_bounds = array<i64: 8, 1>}]} {
    %c0 = arith.constant 0 : index
    %c0_0 = arith.constant 0 : index
    %0 = vector.load %arg1[%c0, %c0_0] : memref<8x16xf32, #tpu.memory_space<vmem>>, vector<8x16xf32>
    %c0_1 = arith.constant 0 : index
    %c0_2 = arith.constant 0 : index
    %1 = vector.load %arg3[%c0_1, %c0_2] : memref<16x32xf32, #tpu.memory_space<vmem>>, vector<16x32xf32>
    %cst = arith.constant dense<0.000000e+00> : vector<8x32xf32>
    %2 = tpu.matmul %0, %1, %cst {dimension_numbers = #tpu.dot_dimension_numbers<[1], [0], [0], [1], [0, 0, 1, 1], [], []>} : vector<8x16xf32>, vector<16x32xf32>, vector<8x32xf32> -> vector<8x32xf32>
    %c0_3 = arith.constant 0 : index
    %c0_4 = arith.constant 0 : index
    %3 = vector.load %arg2[%c0_3, %c0_4] : memref<8x4xf32, #tpu.memory_space<vmem>>, vector<8x4xf32>
    %c0_5 = arith.constant 0 : index
    %c0_6 = arith.constant 0 : index
    %4 = vector.load %arg4[%c0_5, %c0_6] : memref<4x32xf32, #tpu.memory_space<vmem>>, vector<4x32xf32>
    %cst_7 = arith.constant dense<0.000000e+00> : vector<8x32xf32>
    %5 = tpu.matmul %3, %4, %cst_7 {dimension_numbers = #tpu.dot_dimension_numbers<[1], [0], [0], [1], [0, 0, 1, 1], [], []>} : vector<8x4xf32>, vector<4x32xf32>, vector<8x32xf32> -> vector<8x32xf32>
    %6 = arith.addf %2, %5 : vector<8x32xf32>
    %c0_8 = arith.constant 0 : index
    %c0_9 = arith.constant 0 : index
    %7 = vector.load %arg5[%c0_8, %c0_9] : memref<1x32xf32, #tpu.memory_space<vmem>>, vector<1x32xf32>
    %8 = vector.broadcast %7 : vector<1x32xf32> to vector<8x32xf32>
    %9 = arith.addf %6, %8 : vector<8x32xf32>
    %cst_10 = arith.constant 0.000000e+00 : f32
    %10 = vector.broadcast %cst_10 : f32 to vector<8x32xf32>
    %11 = arith.maximumf %9, %10 : vector<8x32xf32>
    %c0_11 = arith.constant 0 : index
    %c0_12 = arith.constant 0 : index
    %12 = vector.load %arg6[%c0_11, %c0_12] : memref<32x32xf32, #tpu.memory_space<vmem>>, vector<32x32xf32>
    %cst_13 = arith.constant dense<0.000000e+00> : vector<8x32xf32>
    %13 = tpu.matmul %11, %12, %cst_13 {dimension_numbers = #tpu.dot_dimension_numbers<[1], [0], [0], [1], [0, 0, 1, 1], [], []>} : vector<8x32xf32>, vector<32x32xf32>, vector<8x32xf32> -> vector<8x32xf32>
    %c0_14 = arith.constant 0 : index
    %c0_15 = arith.constant 0 : index
    %14 = vector.load %arg7[%c0_14, %c0_15] : memref<1x32xf32, #tpu.memory_space<vmem>>, vector<1x32xf32>
    %15 = vector.broadcast %14 : vector<1x32xf32> to vector<8x32xf32>
    %16 = arith.addf %13, %15 : vector<8x32xf32>
    %cst_16 = arith.constant 0.000000e+00 : f32
    %17 = vector.broadcast %cst_16 : f32 to vector<8x32xf32>
    %18 = arith.maximumf %16, %17 : vector<8x32xf32>
    %c0_17 = arith.constant 0 : index
    %c0_18 = arith.constant 0 : index
    %19 = vector.load %arg8[%c0_17, %c0_18] : memref<1x32xf32, #tpu.memory_space<vmem>>, vector<1x32xf32>
    %20 = vector.broadcast %19 : vector<1x32xf32> to vector<8x32xf32>
    %21 = arith.mulf %18, %20 : vector<8x32xf32>
    %cst_19 = arith.constant dense<0.000000e+00> : vector<8xf32>
    %22 = vector.multi_reduction <add>, %21, %cst_19 [1] : vector<8x32xf32> to vector<8xf32>
    %23 = vector.shape_cast %22 : vector<8xf32> to vector<8x1xf32>
    %c0_20 = arith.constant 0 : index
    %c0_21 = arith.constant 0 : index
    %24 = vector.load %arg9[%c0_20, %c0_21] : memref<1x1xf32, #tpu.memory_space<vmem>>, vector<1x1xf32>
    %25 = vector.broadcast %24 : vector<1x1xf32> to vector<8x1xf32>
    %26 = arith.addf %23, %25 : vector<8x1xf32>
    %c0_22 = arith.constant 0 : index
    %c0_23 = arith.constant 0 : index
    %27 = vector.load %arg10[%c0_22, %c0_23] : memref<8x1xf32, #tpu.memory_space<vmem>>, vector<8x1xf32>
    tpu.vector_store %arg10[%c0_22, %c0_23], %26 {strides = array<i32>} : memref<8x1xf32, #tpu.memory_space<vmem>>, vector<8x1xf32>,
    return
  }
  func.func @transform_0(%arg0: i32) -> (i32, i32) {
    %c0_i32 = arith.constant 0 : i32
    %c0_i32_0 = arith.constant 0 : i32
    return %arg0, %c0_i32 : i32, i32
  }
  func.func @transform_1(%arg0: i32) -> (i32, i32) {
    %c0_i32 = arith.constant 0 : i32
    %c0_i32_0 = arith.constant 0 : i32
    return %arg0, %c0_i32 : i32, i32
  }
  func.func @transform_2(%arg0: i32) -> (i32, i32) {
    %c0_i32 = arith.constant 0 : i32
    %c0_i32_0 = arith.constant 0 : i32
    %c0_i32_1 = arith.constant 0 : i32
    return %c0_i32, %c0_i32_0 : i32, i32
  }
  func.func @transform_3(%arg0: i32) -> (i32, i32) {
    %c0_i32 = arith.constant 0 : i32
    %c0_i32_0 = arith.constant 0 : i32
    %c0_i32_1 = arith.constant 0 : i32
    return %c0_i32, %c0_i32_0 : i32, i32
  }
  func.func @transform_4(%arg0: i32) -> (i32, i32) {
    %c0_i32 = arith.constant 0 : i32
    %c0_i32_0 = arith.constant 0 : i32
    %c0_i32_1 = arith.constant 0 : i32
    return %c0_i32, %c0_i32_0 : i32, i32
  }
  func.func @transform_5(%arg0: i32) -> (i32, i32) {
    %c0_i32 = arith.constant 0 : i32
    %c0_i32_0 = arith.constant 0 : i32
    %c0_i32_1 = arith.constant 0 : i32
    return %c0_i32, %c0_i32_0 : i32, i32
  }
  func.func @transform_6(%arg0: i32) -> (i32, i32) {
    %c0_i32 = arith.constant 0 : i32
    %c0_i32_0 = arith.constant 0 : i32
    %c0_i32_1 = arith.constant 0 : i32
    return %c0_i32, %c0_i32_0 : i32, i32
  }
  func.func @transform_7(%arg0: i32) -> (i32, i32) {
    %c0_i32 = arith.constant 0 : i32
    %c0_i32_0 = arith.constant 0 : i32
    %c0_i32_1 = arith.constant 0 : i32
    return %c0_i32, %c0_i32_0 : i32, i32
  }
  func.func @transform_8(%arg0: i32) -> (i32, i32) {
    %c0_i32 = arith.constant 0 : i32
    %c0_i32_0 = arith.constant 0 : i32
    %c0_i32_1 = arith.constant 0 : i32
    return %c0_i32, %c0_i32_0 : i32, i32
  }
  func.func @transform_9(%arg0: i32) -> (i32, i32) {
    %c0_i32 = arith.constant 0 : i32
    %c0_i32_0 = arith.constant 0 : i32
    return %arg0, %c0_i32 : i32, i32
  }
}

</mosaic_0001>

<bundles_post_ra>
// kernel: critic_forward.1
= control target key start
LH: loop header
LB: loop body
LE: loop exit
PB: predicated region body
PF: predicated region fallthrough
CT: control target
= control target key end

     0   :  { %s693_s0 = inlined_call_operand.vmem [shape: f32[2,16], index: 0, kind: input, shape index: {}]   ;;  %s694_s1 = inlined_call_operand.hbm [shape: f32[2,4], index: 1, kind: input, shape index: {}]   ;;  %s695_s2 = inlined_call_operand.vmem [shape: f32[16,32], index: 2, kind: input, shape index: {}]   ;;  %s696_s3 = inlined_call_operand.vmem [shape: f32[4,32], index: 3, kind: input, shape index: {}]   ;;  %s697_s4 = inlined_call_operand.hbm [shape: f32[1,32], index: 4, kind: input, shape index: {}]   ;;  %s698_s5 = inlined_call_operand.hbm [shape: f32[32,32], index: 5, kind: input, shape index: {}]   ;;  %s699_s6 = inlined_call_operand.hbm [shape: f32[1,32], index: 6, kind: input, shape index: {}]   ;;  %s700_s7 = inlined_call_operand.vmem [shape: f32[1,32], index: 7, kind: input, shape index: {}]   ;;  %s701_s8 = inlined_call_operand.<no memory space> [shape: f32[1,1], index: 8, kind: input, shape index: {}]   ;;  %s702_s9 = inlined_call_operand.vmem [shape: f32[2,1], index: 9, kind: output, shape index: {}]  }
   0x1   :  { %v14_v0 = vstv %s701_s8 }
   0x2   :  { %15 = vst [vmem:[#allocation2] sm:$0x1] %v14_v0 }
   0x3   :  { %16 = vsyncpa [#allocation4], 0 }
   0x4   :  { %17 = vsyncpa [#allocation6], 0 }
   0x5   :  { %18 = vsyncpa [#allocation9], 0 }
   0x6   :  { %25 = vsyncadd [#allocation4], 96  ;;  %s555_s11 = smov [#allocation5]   ;;  %s556_s13 = smov [#allocation3]  }
   0x7   :  { %s43_s12 = sshll.u32 %s555_s11, 4  ;;  %s26_s14 = sshll.u32 %s556_s13, 4  ;;  %s44_s12 = int_to_ptr.vmem [resolvable:$true] %s43_s12  ;;  %s619_s14 = int_to_ptr.vmem [resolvable:$true] %s26_s14 }
   0x8   :  { %s461_s17 = scalar_lea.hbm %s697_s4, 16 }
   0x9   :  { %p462_p0 = scmp.ne.s32.totalorder %s697_s4, %s461_s17  ;;  %p465_p1 = scmp.lt.u32.totalorder %s461_s17, %s697_s4 }
   0xb   :  { %p467_p2 = pnand %p465_p1, %p462_p0 }
   0xd   :  { %470 = shalt.err (!%p467_p2)
}
   0xe   :  { %s471_s21 = scalar_lea.vmem %s44_s12, 16  ;;  %s475_s22 = scalar_lea.vmem %s44_s12, 32 }
   0xf   :  { %p472_p3 = scmp.ne.s32.totalorder %s44_s12, %s471_s21  ;;  %p476_p4 = scmp.lt.s32.totalorder %s44_s12, %s44_s12 }
  0x10   :  { %p477_p5 = scmp.lt.s32.totalorder %s475_s22, %s471_s21 }
  0x12   :  { %p478_p6 = por %p477_p5, %p476_p4 }
  0x14   :  { %p479_p7 = pnand %p478_p6, %p472_p3 }
  0x16   :  { %482 = shalt.err (!%p479_p7)
}
  0x17   :  { %46 = dma.hbm_to_vmem [thread:$0]  %s697_s4, 16, %s44_s12, [#allocation6]  }
  0x18   :  { %s483_s27 = scalar_lea.hbm %s694_s1, 32 }
  0x19   :  { %p484_p8 = scmp.ne.s32.totalorder %s694_s1, %s483_s27  ;;  %p487_p9 = scmp.lt.u32.totalorder %s483_s27, %s694_s1 }
  0x1b   :  { %p489_p10 = pnand %p487_p9, %p484_p8 }
  0x1d   :  { %492 = shalt.err (!%p489_p10)
}
  0x1e   :  { %s493_s11 = scalar_lea.vmem %s619_s14, 32  ;;  %s497_s4 = scalar_lea.vmem %s619_s14, 128 }
  0x1f   :  { %p494_p11 = scmp.ne.s32.totalorder %s619_s14, %s493_s11  ;;  %p498_p12 = scmp.lt.s32.totalorder %s619_s14, %s619_s14 }
  0x20   :  { %p499_p13 = scmp.lt.s32.totalorder %s497_s4, %s493_s11 }
  0x22   :  { %p500_p0 = por %p499_p13, %p498_p12 }
  0x24   :  { %p501_p1 = pnand %p500_p0, %p494_p11 }
  0x26   :  { %504 = shalt.err (!%p501_p1)
}
  0x27   :  { %s557_s12 = smov 32   ;;  %s558_s13 = smov 2  }
  0x28   :  { %32 = dma.hbm_to_vmem [thread:$0]  %s694_s1, 32, %s619_s14, [#allocation4], %s557_s12, %s557_s12, %s558_s13  }
  0x29   :  { %s559_s17 = smov [#allocation7]   ;;  %s505_s20 = scalar_lea.hbm %s698_s5, 512 }
  0x2a   :  { %s52_s18 = sshll.u32 %s559_s17, 4  ;;  %p506_p2 = scmp.ne.s32.totalorder %s698_s5, %s505_s20  ;;  %s53_s18 = int_to_ptr.vmem [resolvable:$true] %s52_s18 }
  0x2b   :  { %p509_p3 = scmp.lt.u32.totalorder %s505_s20, %s698_s5 }
  0x2d   :  { %p511_p4 = pnand %p509_p3, %p506_p2 }
  0x2f   :  { %514 = shalt.err (!%p511_p4)
}
  0x30   :  { %s515_s25 = scalar_lea.vmem %s53_s18, 512  ;;  %p520_p6 = scmp.lt.s32.totalorder %s53_s18, %s53_s18 }
  0x31   :  { %p516_p5 = scmp.ne.s32.totalorder %s53_s18, %s515_s25  ;;  %p521_p7 = scmp.lt.s32.totalorder %s515_s25, %s515_s25 }
  0x33   :  { %p522_p8 = por %p521_p7, %p520_p6 }
  0x35   :  { %p523_p9 = pnand %p522_p8, %p516_p5 }
  0x37   :  { %526 = shalt.err (!%p523_p9)
}
  0x38   :  { %s560_s1 = smov 128   ;;  %s561_s14 = smov 8  }
  0x39   :  { %58 = dma.hbm_to_vmem [thread:$0]  %s698_s5, 512, %s53_s18, [#allocation6], %s560_s1, %s560_s1, %s561_s14  }
  0x3a   :  { %s562_s28 = smov [#allocation8]   ;;  %s527_s11 = scalar_lea.hbm %s699_s6, 16 }
  0x3b   :  { %s65_s29 = sshll.u32 %s562_s28, 4  ;;  %p528_p10 = scmp.ne.s32.totalorder %s699_s6, %s527_s11  ;;  %s66_s29 = int_to_ptr.vmem [resolvable:$true] %s65_s29 }
  0x3c   :  { %p531_p11 = scmp.lt.u32.totalorder %s527_s11, %s699_s6 }
  0x3e   :  { %p533_p12 = pnand %p531_p11, %p528_p10 }
  0x40   :  { %536 = shalt.err (!%p533_p12)
}
  0x41   :  { %s537_s16 = scalar_lea.vmem %s66_s29, 16  ;;  %s541_s5 = scalar_lea.vmem %s66_s29, 32 }
  0x42   :  { %p538_p13 = scmp.ne.s32.totalorder %s66_s29, %s537_s16  ;;  %p542_p0 = scmp.lt.s32.totalorder %s66_s29, %s66_s29 }
  0x43   :  { %p543_p1 = scmp.lt.s32.totalorder %s541_s5, %s537_s16 }
  0x45   :  { %p544_p2 = por %p543_p1, %p542_p0 }
  0x47   :  { %p545_p3 = pnand %p544_p2, %p538_p13 }
  0x49   :  { %548 = shalt.err (!%p545_p3)
}
  0x4a   :  { %68 = dma.hbm_to_vmem [thread:$0]  %s699_s6, 16, %s66_s29, [#allocation9]  }
  0x4b   :  { %549 = dma.done.wait [#allocation4], 128  }
  0x4c   :  { %550 = vsyncadd [#allocation4], 4294967168 }
  0x4d   :  { %551 = dma.done.wait [#allocation6], 528  }
  0x4e   :  { %552 = vsyncadd [#allocation6], 4294966768 }
  0x4f   :  { %553 = dma.done.wait [#allocation9], 16  }
  0x50   :  { %554 = vsyncadd [#allocation9], 4294967280  ;;  %v563_v1 = vmov 0.0   ;;  %vm564_vm0 = vmmov 0   ;;  %v565_v2 = vmov 0.0|0.0   ;;  %vm94_vm1 = vcmask 1043456  }
  0x51   :  { %418 = vmatprep.subr.mxu1 %v563_v1  ;;  %420 = vmatprep.mubr.msk.f32.mxu1 %vm564_vm0, %v563_v1  ;;  %vm90_vm2 = vcmask 31744   ;;  %v89_v3 = vld [vmem:[%s696_s3] sm:$0xf]  ;;  %v87_v6 = vld [vmem:[%s695_s2 + $0x8] sm:$0xff]  ;;  %vm168_vm3 = vcmask 130048   ;;  %v252_v10 = vld [vmem:[#allocation7 + $0x8] sm:$0xff] }
  0x52   :  { %444 = vmatprep.subr.bf16.mxu0 %v565_v2  ;;  %438 = vmatprep.mubr.msk.f32.mxu0 %vm564_vm0, %v563_v1  ;;  %v88_v4 = vld [vmem:[#allocation3] sm:$0xff]  ;;  %v251_v9 = vld [vmem:[#allocation7] sm:$0xff]  ;;  %v403_v18 = vld [vmem:[#allocation5] ss:$0 sm:$0xff]  ;;  %vm262_vm4 = vcmask 261120   ;;  %vm356_vm5 = vcmask 7168  }
  0x53   :  { %v86_v5 = vld [vmem:[%s695_s2] sm:$0xff]  ;;  %419 = vmatpush3.msk.msra.mxu1 %vm94_vm1, %v89_v3  ;;  %v445_v11 = vpack.c.bf16 %v252_v10, %v251_v9  ;;  %v404_v23 = vld [vmem:[#allocation8] ss:$0 sm:$0xff] }
  0x54   :  { %421 = vmatmul.mubr.msk.f32.vlgmr.msra.gmra.mrb[0].mxu1 %vm90_vm2, %v88_v4  ;;  %441 = vmatprep.subr.bf16.mxu1 %v565_v2  ;;  %v442_v7 = vpack.c.bf16 %v87_v6, %v86_v5  ;;  %v85_v8 = vld [vmem:[%s693_s0] sm:$0xff] }
  0x55   :  { %427 = vmatprep.mubr.msk.f32.mxu1 %vm564_vm0, %v563_v1  ;;  %446 = vmatpush3.bf16.msra.mxu0 %v445_v11  ;;  %v253_v12 = vld [vmem:[#allocation7 + $0x10] sm:$0xff]  ;;  %v254_v13 = vld [vmem:[#allocation7 + $0x18] sm:$0xff] }
  0x56   :  { %443 = vmatpush3.bf16.msra.mxu1 %v442_v7  ;;  %447 = vmatprep.subr.bf16.mxu0 %v565_v2  ;;  %v448_v14 = vpack.c.bf16 %v254_v13, %v253_v12  ;;  %v406_v27 = vld [vmem:[%s700_s7] ss:$0 sm:$0xff] }
  0x57   :  { %v407_v31 = vld [vmem:[#allocation2] ss:$0 sm:$0xff] }
  0x59   :  { %428 = vmatmul.mubr.msk.f32.vlgmr.msra.gmra.mrb[2].mxu1 %vm168_vm3, %v85_v8  ;;  %449 = vmatpush3.bf16.msra.mxu0 %v448_v14 }
 0x127   :  { %v164_v15 = vpop.f32.mrb[0].mxu1 }
 0x128   :  { %v422_v16 = vpop.f32.mrb[1].mxu1 }
 0x12c   :  { %v238_v17 = vpop.f32.mrb[2].mxu1 }
 0x12d   :  { %v239_v19 = vadd.f32 %v238_v17, %v164_v15  ;;  %v429_v20 = vpop.f32.mrb[3].mxu1 }
 0x12f   :  { %v249_v21 = vadd.f32 %v403_v18, %v239_v19 }
 0x131   :  { %v250_v22 = vmax.f32 %v249_v21, 0.0 }
 0x133   :  { %439 = vmatmul.mubr.msk.f32.vlgmr.msra.gmra.mrb[0].mxu0 %vm262_vm4, %v250_v22 }
 0x206   :  { %v332_v24 = vpop.f32.mrb[0].mxu0 }
 0x207   :  { %v333_v25 = vadd.f32 %v404_v23, %v332_v24  ;;  %v440_v26 = vpop.f32.mrb[1].mxu0 }
 0x209   :  { %v336_v28 = vmax.f32 %v333_v25, 0.0 }
 0x20b   :  { %v344_v29 = vmul.f32 %v406_v27, %v336_v28 }
 0x20d   :  { %v345_v30 = vsel %vm262_vm4, %v344_v29, 0.0 }
 0x20e   :  { %346 = vadd.xlane.f32.xlu0 %v345_v30 }
 0x29b   :  { %v347_v32 = vpop.xlane.xlu0 %346 }
 0x29c   :  { %v355_v33 = vadd.f32 %v407_v31, %v347_v32 }
 0x29e   :  { %357 = vst.msk [vmem:[#allocation10] sm:$0xff] %vm356_vm5, %v355_v33 }
 0x2a5   :  { %v375_v34 = vld [vmem:[#allocation10] sm:$0x3] }
 0x2a6   :  { %376 = vst [vmem:[%s702_s9] sm:$0x3] %v375_v34 }
 0x2a7   :  { %393 = vsyncpa [#allocation4], 1 }
 0x2a8   :  { %394 = vsyncpa [#allocation6], 1 }
 0x2a9   :  { %395 = vsyncpa [#allocation9], 1 }

</bundles_post_ra>
